<compile_context>
chip_gen: v5e
topology: v5e:2x2
jax: 0.10.0
libtpu: 0.0.40
codegen_flags: <defaults>
</compile_context>

<pallas_src>
import jax
import jax.numpy as jnp
from jax.experimental import pallas as pl
from jax.experimental.pallas import tpu as pltpu


def _rup(x, m):
    return ((x + m - 1) // m) * m


def _make_kernel(D, H, wcol, S_w, off_B, off_C, off_bl):
    """Fused LSTM_tele step kernel (one grid step == one recurrent step)."""

    def kernel(x_ref, hrow_ref, crow_ref, w_ref,      # inputs
               g_ref, hf_ref, cf_ref,                 # outputs
               row_ref, cst_ref):                     # VMEM carries
        t = pl.program_id(0)
        wdt = w_ref.dtype

        # -- t == 0: load the initial state into the persistent carries -----
        @pl.when(t == 0)
        def _():
            row_ref[...] = hrow_ref[...]     # [0(x) | h0 | h1 | 1 | 0-pad]
            cst_ref[...] = crow_ref[...]     # [c0 | c1]

        # stream x_t into lanes 0:D of the fused input row
        row_ref[:, 0:D] = x_ref[0]

        # -- fused step matmul: gates1 (cols 0:wcol) and the h0-independent
        #    part of gates2 (cols wcol:2*wcol), biases folded via the 1-lane.
        xh = row_ref[...].astype(wdt)                                   # (1, S_w)
        pre = jnp.dot(xh, w_ref[0:S_w, :],
                      preferred_element_type=jnp.float32)               # (1, 2*wcol)

        # -- LSTM cell 1 (gate order [i, f, g, o]; g cols pre-scaled by 2,
        #    so tanh(x) == 2*sigmoid(2x) - 1: one transcendental per row) ----
        sig1 = jax.nn.sigmoid(pre[:, 0:wcol])
        i1 = sig1[:, 0:H]
        f1 = sig1[:, H:2 * H]
        o1 = sig1[:, 3 * H:4 * H]
        g1 = 2.0 * sig1[:, 2 * H:3 * H] - 1.0
        c0_new = f1 * cst_ref[:, 0:H] + i1 * g1
        h0_new = o1 * jnp.tanh(c0_new)
        # incremental stores as soon as values are ready (no concat epilogue)
        row_ref[:, D:D + H] = h0_new
        cst_ref[:, 0:H] = c0_new
        hf_ref[:, 0:H] = h0_new
        cf_ref[:, 0:H] = c0_new

        # -- LSTM cell 2: partial (h1_prev @ W2_hh + b2) already computed ----
        pre2 = pre[:, wcol:2 * wcol] + jnp.dot(
            h0_new.astype(wdt), w_ref[off_B:off_B + H, 0:wcol],
            preferred_element_type=jnp.float32)
        sig2 = jax.nn.sigmoid(pre2)
        i2 = sig2[:, 0:H]
        f2 = sig2[:, H:2 * H]
        o2 = sig2[:, 3 * H:4 * H]
        g2 = 2.0 * sig2[:, 2 * H:3 * H] - 1.0
        c1_new = f2 * cst_ref[:, H:2 * H] + i2 * g2
        h1_new = o2 * jnp.tanh(c1_new)
        row_ref[:, D + H:D + 2 * H] = h1_new
        cst_ref[:, H:2 * H] = c1_new
        hf_ref[:, H:2 * H] = h1_new
        cf_ref[:, H:2 * H] = c1_new

        # -- linear head at full 128-lane tile width (cols n2:wcol are 0) ----
        g_row = jnp.dot(h1_new.astype(wdt), w_ref[off_C:off_C + H, 0:wcol],
                        preferred_element_type=jnp.float32) \
            + w_ref[off_bl:off_bl + 1, 0:wcol].astype(jnp.float32)
        g_ref[...] = g_row.reshape(1, 1, wcol)

    return kernel


class LSTMTelePallas:
    """Pallas LSTM_tele: parameters packed once, T recurrent steps per launch."""

    def __init__(self, params, input_dim, hidden_dim, out_dim,
                 weight_dtype=jnp.bfloat16):
        D, H = input_dim, hidden_dim
        n2 = out_dim * out_dim
        H4 = 4 * H
        self._H = H

        wcol = _rup(max(H4, n2), 128)       # gate / head column tile width
        S_w = _rup(D + 2 * H + 1, 128)      # fused-row width: [x|h0|h1|1|pad]
        off_B = S_w                         # W2_ih rows
        off_C = off_B + _rup(H, 16)         # linear weight rows
        off_bl = off_C + _rup(H, 16)        # linear bias row
        n_rows = off_bl + 16

        # -- pre-scale g-gate columns by 2 so tanh(x) = 2*sigmoid(2x) - 1 ----
        def scale_g(m):
            return m.at[..., 2 * H:3 * H].multiply(2.0)

        w1i = scale_g(params["lstm1.weight_ih"].T)                      # (D, 4H)
        w1h = scale_g(params["lstm1.weight_hh"].T)                      # (H, 4H)
        b1 = scale_g((params["lstm1.bias_ih"] + params["lstm1.bias_hh"])[None, :])
        w2i = scale_g(params["lstm2.weight_ih"].T)                      # (H, 4H)
        w2h = scale_g(params["lstm2.weight_hh"].T)                      # (H, 4H)
        b2 = scale_g((params["lstm2.bias_ih"] + params["lstm2.bias_hh"])[None, :])
        wl = params["linear.weight"].T                                  # (H, n2)
        bl = params["linear.bias"][None, :]                             # (1, n2)

        # -- single weight slab (built ONCE) ----------------------------------
        #   rows 0:S_w          fused step RHS:
        #                         cols 0:wcol      -> gates1  ([W1_ih;W1_hh;0;b1])
        #                         cols wcol:2wcol  -> partial2 ([0;0;W2_hh;b2])
        #   rows off_B:off_B+H  W2_ih^T  (only layer-2 term that needs h0_new)
        #   rows off_C:off_C+H  linear.weight^T (zero-padded to wcol)
        #   row  off_bl         linear.bias
        slab = jnp.zeros((n_rows, 2 * wcol), jnp.float32)
        slab = slab.at[0:D, 0:H4].set(w1i)
        slab = slab.at[D:D + H, 0:H4].set(w1h)
        slab = slab.at[D + 2 * H, 0:H4].set(b1[0])
        slab = slab.at[D + H:D + 2 * H, wcol:wcol + H4].set(w2h)
        slab = slab.at[D + 2 * H, wcol:wcol + H4].set(b2[0])
        slab = slab.at[off_B:off_B + H, 0:H4].set(w2i)
        slab = slab.at[off_C:off_C + H, 0:n2].set(wl)
        slab = slab.at[off_bl, 0:n2].set(bl[0])
        self._slab = slab.astype(weight_dtype)

        kernel = _make_kernel(D, H, wcol, S_w, off_B, off_C, off_bl)

        def seq_forward(x_seq, hidden, cell, slab_arg):
            T = x_seq.shape[0]
            x3 = x_seq.reshape(T, 1, D).astype(jnp.float32)
            hrow = jnp.zeros((1, S_w), jnp.float32)
            hrow = hrow.at[0, D:D + 2 * H].set(
                hidden.reshape(2 * H).astype(jnp.float32))
            hrow = hrow.at[0, D + 2 * H].set(1.0)            # bias lane
            crow = cell.reshape(1, 2 * H).astype(jnp.float32)

            grid_spec = pltpu.PrefetchScalarGridSpec(
                num_scalar_prefetch=0,
                grid=(T,),
                in_specs=[
                    pl.BlockSpec((1, 1, D), lambda t: (t, 0, 0)),        # x_t
                    pl.BlockSpec((1, S_w), lambda t: (0, 0)),            # h init row
                    pl.BlockSpec((1, 2 * H), lambda t: (0, 0)),          # c init row
                    pl.BlockSpec((n_rows, 2 * wcol), lambda t: (0, 0)),  # weights (resident)
                ],
                out_specs=[
                    pl.BlockSpec((1, 1, wcol), lambda t: (t, 0, 0)),     # g_t
                    pl.BlockSpec((1, 2 * H), lambda t: (0, 0)),          # final [h0|h1]
                    pl.BlockSpec((1, 2 * H), lambda t: (0, 0)),          # final [c0|c1]
                ],
                scratch_shapes=[
                    pltpu.VMEM((1, S_w), jnp.float32),                   # [x|h0|h1|1] carry
                    pltpu.VMEM((1, 2 * H), jnp.float32),                 # [c0|c1] carry
                ],
            )
            g_seq, h_fin, c_fin = pl.pallas_call(
                kernel,
                out_shape=(
                    jax.ShapeDtypeStruct((T, 1, wcol), jnp.float32),
                    jax.ShapeDtypeStruct((1, 2 * H), jnp.float32),
                    jax.ShapeDtypeStruct((1, 2 * H), jnp.float32),
                ),
                grid_spec=grid_spec,
                compiler_params=pltpu.CompilerParams(
                    dimension_semantics=("arbitrary",)),
            )(x3, hrow, crow, slab_arg)

            g = g_seq[:, 0, 0:n2].reshape(T, out_dim, out_dim)
            h_stack = h_fin.reshape(2, 1, H)
            c_stack = c_fin.reshape(2, 1, H)
            return g, h_stack, c_stack

        self._seq_forward = jax.jit(seq_forward)

    def forward_seq(self, x_seq, hidden, cell):
        """Run all T recurrent steps inside ONE kernel launch."""
        return self._seq_forward(x_seq, hidden, cell, self._slab)

    def __call__(self, lstm_input, hidden, cell):
        """Single-step forward matching LSTM_tele.forward (T=1 fallback)."""
        g_seq, h_stack, c_stack = self._seq_forward(
            lstm_input[None, :], hidden, cell, self._slab)
        return g_seq[0], h_stack, c_stack


def init_params(key, input_dim, hidden_dim, out_dim):
    """Deterministic init mirroring the PyTorch parameter shapes."""
    keys = jax.random.split(key, 10)
    k1 = 1.0 / jnp.sqrt(hidden_dim)
    u = lambda k, shape, s: jax.random.uniform(
        k, shape, jnp.float32, minval=-s, maxval=s)
    return {
        "lstm1.weight_ih": u(keys[0], (4 * hidden_dim, input_dim), k1),
        "lstm1.weight_hh": u(keys[1], (4 * hidden_dim, hidden_dim), k1),
        "lstm1.bias_ih":   u(keys[2], (4 * hidden_dim,), k1),
        "lstm1.bias_hh":   u(keys[3], (4 * hidden_dim,), k1),
        "lstm2.weight_ih": u(keys[4], (4 * hidden_dim, hidden_dim), k1),
        "lstm2.weight_hh": u(keys[5], (4 * hidden_dim, hidden_dim), k1),
        "lstm2.bias_ih":   u(keys[6], (4 * hidden_dim,), k1),
        "lstm2.bias_hh":   u(keys[7], (4 * hidden_dim,), k1),
        "linear.weight":   u(keys[8], (out_dim * out_dim, hidden_dim), k1),
        "linear.bias":     u(keys[9], (out_dim * out_dim,), k1),
    }


def _ref_forward(lstm_input, hidden, cell, params, out_dim):
    """Pure-JAX reference (matches torch.nn.LSTMCell semantics)."""
    def cell_fn(x, h, c, w_ih, w_hh, b_ih, b_hh):
        gates = x @ w_ih.T + b_ih + h @ w_hh.T + b_hh
        H = h.shape[-1]
        i, f, g, o = (gates[:, 0:H], gates[:, H:2 * H],
                      gates[:, 2 * H:3 * H], gates[:, 3 * H:4 * H])
        c_new = jax.nn.sigmoid(f) * c + jax.nn.sigmoid(i) * jnp.tanh(g)
        h_new = jax.nn.sigmoid(o) * jnp.tanh(c_new)
        return h_new, c_new

    x = lstm_input[None, :]
    h0, c0 = cell_fn(x, hidden[0], cell[0],
                     params["lstm1.weight_ih"], params["lstm1.weight_hh"],
                     params["lstm1.bias_ih"], params["lstm1.bias_hh"])
    h1, c1 = cell_fn(h0, hidden[1], cell[1],
                     params["lstm2.weight_ih"], params["lstm2.weight_hh"],
                     params["lstm2.bias_ih"], params["lstm2.bias_hh"])
    g = h1 @ params["linear.weight"].T + params["linear.bias"]
    return (jnp.reshape(g, (out_dim, out_dim)),
            jnp.stack((h0, h1)), jnp.stack((c0, c1)))


def _ref_seq(x_seq, hidden, cell, params, out_dim):
    hs, cs, gs = hidden, cell, []
    for t in range(x_seq.shape[0]):
        g, hs, cs = _ref_forward(x_seq[t], hs, cs, params, out_dim)
        gs.append(g)
    return jnp.stack(gs), hs, cs


if __name__ == "__main__":
    input_dim = 32
    lstm_hidden_dim = 32
    out_dim = 8
    seq_len = 8

    key = jax.random.PRNGKey(0)
    k_in, k_h, k_c, k_p, k_seq = jax.random.split(key, 5)

    lstm_input = jax.random.normal(k_in, (input_dim,), jnp.float32)
    hidden = jax.random.normal(k_h, (2, 1, lstm_hidden_dim), jnp.float32)
    cell = jax.random.normal(k_c, (2, 1, lstm_hidden_dim), jnp.float32)
    x_seq = jax.random.normal(k_seq, (seq_len, input_dim), jnp.float32)
    params = init_params(k_p, input_dim, lstm_hidden_dim, out_dim)

    # ---- f32-weight instance: near-exact vs. the torch-semantics reference --
    model_f32 = LSTMTelePallas(params, input_dim, lstm_hidden_dim, out_dim,
                               weight_dtype=jnp.float32)
    g, h_out, c_out = model_f32(lstm_input, hidden, cell)
    jax.block_until_ready((g, h_out, c_out))

    g_r, h_r, c_r = _ref_forward(lstm_input, hidden, cell, params, out_dim)
    assert jnp.allclose(g, g_r, atol=2e-4), "f32 g mismatch"
    assert jnp.allclose(h_out, h_r, atol=2e-4), "f32 hidden mismatch"
    assert jnp.allclose(c_out, c_r, atol=2e-4), "f32 cell mismatch"

    # ---- default bf16-MXU instance (looser tolerance, as per perf review) ---
    model = LSTMTelePallas(params, input_dim, lstm_hidden_dim, out_dim)
    g_b, h_b, c_b = model(lstm_input, hidden, cell)
    jax.block_until_ready((g_b, h_b, c_b))
    assert jnp.allclose(g_b, g_r, atol=5e-2), "bf16 g mismatch"
    assert jnp.allclose(h_b, h_r, atol=5e-2), "bf16 hidden mismatch"
    assert jnp.allclose(c_b, c_r, atol=5e-2), "bf16 cell mismatch"

    # ---- sequence mode: T recurrent steps inside a single kernel launch -----
    gs, hs, cs = model_f32.forward_seq(x_seq, hidden, cell)
    jax.block_until_ready((gs, hs, cs))
    gs_r, hs_r, cs_r = _ref_seq(x_seq, hidden, cell, params, out_dim)
    assert jnp.allclose(gs, gs_r, atol=1e-3), "f32 seq g mismatch"
    assert jnp.allclose(hs, hs_r, atol=1e-3), "f32 seq hidden mismatch"
    assert jnp.allclose(cs, cs_r, atol=1e-3), "f32 seq cell mismatch"

    gs_b, hs_b, cs_b = model.forward_seq(x_seq, hidden, cell)
    jax.block_until_ready((gs_b, hs_b, cs_b))
    assert jnp.allclose(gs_b, gs_r, atol=1.5e-1), "bf16 seq g mismatch"

    print("KERNEL_OK")
</pallas_src>

<mosaic_0001>
module attributes {stable_mosaic.version = 11 : i64} {
  func.func @kernel(%arg0: i32, %arg1: memref<1x1x32xf32, #tpu.memory_space<vmem>>, %arg2: memref<1x128xf32, #tpu.memory_space<vmem>>, %arg3: memref<1x64xf32, #tpu.memory_space<vmem>>, %arg4: memref<208x256xf32, #tpu.memory_space<vmem>>, %arg5: memref<1x1x128xf32, #tpu.memory_space<vmem>>, %arg6: memref<1x64xf32, #tpu.memory_space<vmem>>, %arg7: memref<1x64xf32, #tpu.memory_space<vmem>>, %arg8: memref<1x128xf32, #tpu.memory_space<vmem>>, %arg9: memref<1x64xf32, #tpu.memory_space<vmem>>) attributes {dimension_semantics = [#tpu.dimension_semantics<arbitrary>], iteration_bounds = array<i64: 1>, scalar_prefetch = 0 : i64, scratch_operands = 2 : i64, tpu.core_type = #tpu.core_type<tc>, window_params = [{transform_indices = @transform_0, window_bounds = array<i64: 1, 1, 32>}, {pipeline_mode = #tpu.pipeline_mode<synchronous>, transform_indices = @transform_1, window_bounds = array<i64: 1, 128>}, {pipeline_mode = #tpu.pipeline_mode<synchronous>, transform_indices = @transform_2, window_bounds = array<i64: 1, 64>}, {pipeline_mode = #tpu.pipeline_mode<synchronous>, transform_indices = @transform_3, window_bounds = array<i64: 208, 256>}, {transform_indices = @transform_4, window_bounds = array<i64: 1, 1, 128>}, {pipeline_mode = #tpu.pipeline_mode<synchronous>, transform_indices = @transform_5, window_bounds = array<i64: 1, 64>}, {pipeline_mode = #tpu.pipeline_mode<synchronous>, transform_indices = @transform_6, window_bounds = array<i64: 1, 64>}]} {
    %c0_i32 = arith.constant 0 : i32
    %0 = arith.cmpi eq, %arg0, %c0_i32 : i32
    %1 = arith.extui %0 : i1 to i32
    %c0_i32_0 = arith.constant 0 : i32
    %2 = arith.cmpi ne, %1, %c0_i32_0 : i32
    scf.if %2 {
      %c0_41 = arith.constant 0 : index
      %c0_42 = arith.constant 0 : index
      %66 = vector.load %arg2[%c0_41, %c0_42] : memref<1x128xf32, #tpu.memory_space<vmem>>, vector<1x128xf32>
      %c0_43 = arith.constant 0 : index
      %c0_44 = arith.constant 0 : index
      %67 = vector.load %arg8[%c0_43, %c0_44] : memref<1x128xf32, #tpu.memory_space<vmem>>, vector<1x128xf32>
      tpu.vector_store %arg8[%c0_43, %c0_44], %66 {strides = array<i32>} : memref<1x128xf32, #tpu.memory_space<vmem>>, vector<1x128xf32>,
      %c0_45 = arith.constant 0 : index
      %c0_46 = arith.constant 0 : index
      %68 = vector.load %arg3[%c0_45, %c0_46] : memref<1x64xf32, #tpu.memory_space<vmem>>, vector<1x64xf32>
      %c0_47 = arith.constant 0 : index
      %c0_48 = arith.constant 0 : index
      %69 = vector.load %arg9[%c0_47, %c0_48] : memref<1x64xf32, #tpu.memory_space<vmem>>, vector<1x64xf32>
      tpu.vector_store %arg9[%c0_47, %c0_48], %68 {strides = array<i32>} : memref<1x64xf32, #tpu.memory_space<vmem>>, vector<1x64xf32>,
    } else {
    }
    %c0 = arith.constant 0 : index
    %c0_1 = arith.constant 0 : index
    %c0_2 = arith.constant 0 : index
    %3 = vector.load %arg1[%c0, %c0_1, %c0_2] : memref<1x1x32xf32, #tpu.memory_space<vmem>>, vector<1x1x32xf32>
    %4 = vector.shape_cast %3 : vector<1x1x32xf32> to vector<1x32xf32>
    %c0_3 = arith.constant 0 : index
    %c0_4 = arith.constant 0 : index
    %5 = vector.load %arg8[%c0_3, %c0_4] : memref<1x128xf32, #tpu.memory_space<vmem>>, vector<1x32xf32>
    tpu.vector_store %arg8[%c0_3, %c0_4], %4 {strides = array<i32>} : memref<1x128xf32, #tpu.memory_space<vmem>>, vector<1x32xf32>,
    %c0_5 = arith.constant 0 : index
    %c0_6 = arith.constant 0 : index
    %6 = vector.load %arg8[%c0_5, %c0_6] : memref<1x128xf32, #tpu.memory_space<vmem>>, vector<1x128xf32>
    %c0_7 = arith.constant 0 : index
    %c0_8 = arith.constant 0 : index
    %7 = vector.load %arg4[%c0_7, %c0_8] : memref<208x256xf32, #tpu.memory_space<vmem>>, vector<128x256xf32>
    %cst = arith.constant dense<0.000000e+00> : vector<1x256xf32>
    %8 = tpu.matmul %6, %7, %cst {dimension_numbers = #tpu.dot_dimension_numbers<[1], [0], [0], [1], [0, 0, 1, 1], [], []>} : vector<1x128xf32>, vector<128x256xf32>, vector<1x256xf32> -> vector<1x256xf32>
    %9 = vector.extract_strided_slice %8 {offsets = [0, 0], sizes = [1, 128], strides = [1, 1]} : vector<1x256xf32> to vector<1x128xf32>
    %10 = arith.negf %9 : vector<1x128xf32>
    %11 = math.exp %10 : vector<1x128xf32>
    %cst_9 = arith.constant 1.000000e+00 : f32
    %12 = vector.broadcast %cst_9 : f32 to vector<1x128xf32>
    %13 = arith.addf %12, %11 : vector<1x128xf32>
    %14 = arith.divf %12, %13 : vector<1x128xf32>
    %15 = vector.extract_strided_slice %14 {offsets = [0, 0], sizes = [1, 32], strides = [1, 1]} : vector<1x128xf32> to vector<1x32xf32>
    %16 = vector.extract_strided_slice %14 {offsets = [0, 32], sizes = [1, 32], strides = [1, 1]} : vector<1x128xf32> to vector<1x32xf32>
    %17 = vector.extract_strided_slice %14 {offsets = [0, 96], sizes = [1, 32], strides = [1, 1]} : vector<1x128xf32> to vector<1x32xf32>
    %18 = vector.extract_strided_slice %14 {offsets = [0, 64], sizes = [1, 32], strides = [1, 1]} : vector<1x128xf32> to vector<1x32xf32>
    %cst_10 = arith.constant 2.000000e+00 : f32
    %19 = vector.broadcast %cst_10 : f32 to vector<1x32xf32>
    %20 = arith.mulf %19, %18 : vector<1x32xf32>
    %cst_11 = arith.constant 1.000000e+00 : f32
    %21 = vector.broadcast %cst_11 : f32 to vector<1x32xf32>
    %22 = arith.subf %20, %21 : vector<1x32xf32>
    %c0_12 = arith.constant 0 : index
    %c0_13 = arith.constant 0 : index
    %23 = vector.load %arg9[%c0_12, %c0_13] : memref<1x64xf32, #tpu.memory_space<vmem>>, vector<1x32xf32>
    %24 = arith.mulf %16, %23 : vector<1x32xf32>
    %25 = arith.mulf %15, %22 : vector<1x32xf32>
    %26 = arith.addf %24, %25 : vector<1x32xf32>
    %27 = math.tanh %26 : vector<1x32xf32>
    %28 = arith.mulf %17, %27 : vector<1x32xf32>
    %c0_14 = arith.constant 0 : index
    %c32 = arith.constant 32 : index
    %29 = vector.load %arg8[%c0_14, %c32] : memref<1x128xf32, #tpu.memory_space<vmem>>, vector<1x32xf32>
    tpu.vector_store %arg8[%c0_14, %c32], %28 {strides = array<i32>} : memref<1x128xf32, #tpu.memory_space<vmem>>, vector<1x32xf32>,
    %c0_15 = arith.constant 0 : index
    %c0_16 = arith.constant 0 : index
    %30 = vector.load %arg9[%c0_15, %c0_16] : memref<1x64xf32, #tpu.memory_space<vmem>>, vector<1x32xf32>
    tpu.vector_store %arg9[%c0_15, %c0_16], %26 {strides = array<i32>} : memref<1x64xf32, #tpu.memory_space<vmem>>, vector<1x32xf32>,
    %c0_17 = arith.constant 0 : index
    %c0_18 = arith.constant 0 : index
    %31 = vector.load %arg6[%c0_17, %c0_18] : memref<1x64xf32, #tpu.memory_space<vmem>>, vector<1x32xf32>
    tpu.vector_store %arg6[%c0_17, %c0_18], %28 {strides = array<i32>} : memref<1x64xf32, #tpu.memory_space<vmem>>, vector<1x32xf32>,
    %c0_19 = arith.constant 0 : index
    %c0_20 = arith.constant 0 : index
    %32 = vector.load %arg7[%c0_19, %c0_20] : memref<1x64xf32, #tpu.memory_space<vmem>>, vector<1x32xf32>
    tpu.vector_store %arg7[%c0_19, %c0_20], %26 {strides = array<i32>} : memref<1x64xf32, #tpu.memory_space<vmem>>, vector<1x32xf32>,
    %33 = vector.extract_strided_slice %8 {offsets = [0, 128], sizes = [1, 128], strides = [1, 1]} : vector<1x256xf32> to vector<1x128xf32>
    %c128 = arith.constant 128 : index
    %c0_21 = arith.constant 0 : index
    %34 = vector.load %arg4[%c128, %c0_21] : memref<208x256xf32, #tpu.memory_space<vmem>>, vector<32x128xf32>
    %cst_22 = arith.constant dense<0.000000e+00> : vector<1x128xf32>
    %35 = tpu.matmul %28, %34, %cst_22 {dimension_numbers = #tpu.dot_dimension_numbers<[1], [0], [0], [1], [0, 0, 1, 1], [], []>} : vector<1x32xf32>, vector<32x128xf32>, vector<1x128xf32> -> vector<1x128xf32>
    %36 = arith.addf %33, %35 : vector<1x128xf32>
    %37 = arith.negf %36 : vector<1x128xf32>
    %38 = math.exp %37 : vector<1x128xf32>
    %cst_23 = arith.constant 1.000000e+00 : f32
    %39 = vector.broadcast %cst_23 : f32 to vector<1x128xf32>
    %40 = arith.addf %39, %38 : vector<1x128xf32>
    %41 = arith.divf %39, %40 : vector<1x128xf32>
    %42 = vector.extract_strided_slice %41 {offsets = [0, 0], sizes = [1, 32], strides = [1, 1]} : vector<1x128xf32> to vector<1x32xf32>
    %43 = vector.extract_strided_slice %41 {offsets = [0, 32], sizes = [1, 32], strides = [1, 1]} : vector<1x128xf32> to vector<1x32xf32>
    %44 = vector.extract_strided_slice %41 {offsets = [0, 96], sizes = [1, 32], strides = [1, 1]} : vector<1x128xf32> to vector<1x32xf32>
    %45 = vector.extract_strided_slice %41 {offsets = [0, 64], sizes = [1, 32], strides = [1, 1]} : vector<1x128xf32> to vector<1x32xf32>
    %cst_24 = arith.constant 2.000000e+00 : f32
    %46 = vector.broadcast %cst_24 : f32 to vector<1x32xf32>
    %47 = arith.mulf %46, %45 : vector<1x32xf32>
    %cst_25 = arith.constant 1.000000e+00 : f32
    %48 = vector.broadcast %cst_25 : f32 to vector<1x32xf32>
    %49 = arith.subf %47, %48 : vector<1x32xf32>
    %c0_26 = arith.constant 0 : index
    %c32_27 = arith.constant 32 : index
    %50 = vector.load %arg9[%c0_26, %c32_27] : memref<1x64xf32, #tpu.memory_space<vmem>>, vector<1x32xf32>
    %51 = arith.mulf %43, %50 : vector<1x32xf32>
    %52 = arith.mulf %42, %49 : vector<1x32xf32>
    %53 = arith.addf %51, %52 : vector<1x32xf32>
    %54 = math.tanh %53 : vector<1x32xf32>
    %55 = arith.mulf %44, %54 : vector<1x32xf32>
    %c0_28 = arith.constant 0 : index
    %c64 = arith.constant 64 : index
    %56 = vector.load %arg8[%c0_28, %c64] : memref<1x128xf32, #tpu.memory_space<vmem>>, vector<1x32xf32>
    tpu.vector_store %arg8[%c0_28, %c64], %55 {strides = array<i32>} : memref<1x128xf32, #tpu.memory_space<vmem>>, vector<1x32xf32>,
    %c0_29 = arith.constant 0 : index
    %c32_30 = arith.constant 32 : index
    %57 = vector.load %arg9[%c0_29, %c32_30] : memref<1x64xf32, #tpu.memory_space<vmem>>, vector<1x32xf32>
    tpu.vector_store %arg9[%c0_29, %c32_30], %53 {strides = array<i32>} : memref<1x64xf32, #tpu.memory_space<vmem>>, vector<1x32xf32>,
    %c0_31 = arith.constant 0 : index
    %c32_32 = arith.constant 32 : index
    %58 = vector.load %arg6[%c0_31, %c32_32] : memref<1x64xf32, #tpu.memory_space<vmem>>, vector<1x32xf32>
    tpu.vector_store %arg6[%c0_31, %c32_32], %55 {strides = array<i32>} : memref<1x64xf32, #tpu.memory_space<vmem>>, vector<1x32xf32>,
    %c0_33 = arith.constant 0 : index
    %c32_34 = arith.constant 32 : index
    %59 = vector.load %arg7[%c0_33, %c32_34] : memref<1x64xf32, #tpu.memory_space<vmem>>, vector<1x32xf32>
    tpu.vector_store %arg7[%c0_33, %c32_34], %53 {strides = array<i32>} : memref<1x64xf32, #tpu.memory_space<vmem>>, vector<1x32xf32>,
    %c160 = arith.constant 160 : index
    %c0_35 = arith.constant 0 : index
    %60 = vector.load %arg4[%c160, %c0_35] : memref<208x256xf32, #tpu.memory_space<vmem>>, vector<32x128xf32>
    %cst_36 = arith.constant dense<0.000000e+00> : vector<1x128xf32>
    %61 = tpu.matmul %55, %60, %cst_36 {dimension_numbers = #tpu.dot_dimension_numbers<[1], [0], [0], [1], [0, 0, 1, 1], [], []>} : vector<1x32xf32>, vector<32x128xf32>, vector<1x128xf32> -> vector<1x128xf32>
    %c192 = arith.constant 192 : index
    %c0_37 = arith.constant 0 : index
    %62 = vector.load %arg4[%c192, %c0_37] : memref<208x256xf32, #tpu.memory_space<vmem>>, vector<1x128xf32>
    %63 = arith.addf %61, %62 : vector<1x128xf32>
    %64 = vector.shape_cast %63 : vector<1x128xf32> to vector<1x1x128xf32>
    %c0_38 = arith.constant 0 : index
    %c0_39 = arith.constant 0 : index
    %c0_40 = arith.constant 0 : index
    %65 = vector.load %arg5[%c0_38, %c0_39, %c0_40] : memref<1x1x128xf32, #tpu.memory_space<vmem>>, vector<1x1x128xf32>
    tpu.vector_store %arg5[%c0_38, %c0_39, %c0_40], %64 {strides = array<i32>} : memref<1x1x128xf32, #tpu.memory_space<vmem>>, vector<1x1x128xf32>,
    return
  }
  func.func @transform_0(%arg0: i32) -> (i32, i32, i32) {
    %c0_i32 = arith.constant 0 : i32
    %c0_i32_0 = arith.constant 0 : i32
    %c0_i32_1 = arith.constant 0 : i32
    return %arg0, %c0_i32, %c0_i32_0 : i32, i32, i32
  }
  func.func @transform_1(%arg0: i32) -> (i32, i32) {
    %c0_i32 = arith.constant 0 : i32
    %c0_i32_0 = arith.constant 0 : i32
    %c0_i32_1 = arith.constant 0 : i32
    return %c0_i32, %c0_i32_0 : i32, i32
  }
  func.func @transform_2(%arg0: i32) -> (i32, i32) {
    %c0_i32 = arith.constant 0 : i32
    %c0_i32_0 = arith.constant 0 : i32
    %c0_i32_1 = arith.constant 0 : i32
    return %c0_i32, %c0_i32_0 : i32, i32
  }
  func.func @transform_3(%arg0: i32) -> (i32, i32) {
    %c0_i32 = arith.constant 0 : i32
    %c0_i32_0 = arith.constant 0 : i32
    %c0_i32_1 = arith.constant 0 : i32
    return %c0_i32, %c0_i32_0 : i32, i32
  }
  func.func @transform_4(%arg0: i32) -> (i32, i32, i32) {
    %c0_i32 = arith.constant 0 : i32
    %c0_i32_0 = arith.constant 0 : i32
    %c0_i32_1 = arith.constant 0 : i32
    return %arg0, %c0_i32, %c0_i32_0 : i32, i32, i32
  }
  func.func @transform_5(%arg0: i32) -> (i32, i32) {
    %c0_i32 = arith.constant 0 : i32
    %c0_i32_0 = arith.constant 0 : i32
    %c0_i32_1 = arith.constant 0 : i32
    return %c0_i32, %c0_i32_0 : i32, i32
  }
  func.func @transform_6(%arg0: i32) -> (i32, i32) {
    %c0_i32 = arith.constant 0 : i32
    %c0_i32_0 = arith.constant 0 : i32
    %c0_i32_1 = arith.constant 0 : i32
    return %c0_i32, %c0_i32_0 : i32, i32
  }
}

</mosaic_0001>

<bundles_post_ra>
// kernel: squeeze.1
= control target key start
LH: loop header
LB: loop body
LE: loop exit
PB: predicated region body
PF: predicated region fallthrough
CT: control target
= control target key end

     0   :  { %s130_s0 = inlined_call_operand.vmem [shape: f32[64], index: 0, kind: input, shape index: {}]   ;;  %s131_s1 = inlined_call_operand.hbm [shape: f32[1,8,8], index: 1, kind: output, shape index: {}]  }
   0x1   :  { %v5_v0 = vld [vmem:[%s130_s0] sm:$0x1] }
   0x2   :  { %6 = vst [vmem:[#allocation2] sm:$0x1] %v5_v0 }
   0x3   :  { %2 = vsyncpa [#allocation1], 0  ;;  %s98_s0 = smov 120   ;;  %s99_s8 = smov 104   ;;  %vm8_vm0 = vcmask 64512  }
   0x4   :  { %s100_s9 = smov 88   ;;  %s101_s10 = smov 112  }
   0x5   :  { %s102_s11 = smov 96   ;;  %s103_s12 = smov 80  }
   0x6   :  { %s104_s13 = smov 72   ;;  %s105_s14 = smov [#allocation0]  }
   0x7   :  { %s55_s15 = sshll.u32 %s105_s14, 4  ;;  %s57_s1 = sshll.u32 %s131_s1, 4  ;;  %s56_s15 = int_to_ptr.vmem [resolvable:$true] %s55_s15  ;;  %s58_s1 = int_to_ptr.hbm [resolvable:$true] %s57_s1 }
   0x9   :  { %v10_v1 = vld [vmem:[#allocation2] sm:$0x1]  }
   0xa   :  { %v22_v2 = vld [vmem:[#allocation2] sm:$0x1]   ;;  %11 = vrot.lane.b32.xlu0 %v10_v1, %s98_s0 }
   0xb   :  { %23 = vrot.lane.b32.xlu1 %v22_v2, %s99_s8  ;;  %v34_v3 = vld [vmem:[#allocation2] sm:$0x1]  }
   0xc   :  { %35 = vrot.lane.b32.xlu2 %v34_v3, %s100_s9  ;;  %v16_v4 = vld [vmem:[#allocation2] sm:$0x1]  }
   0xd   :  { %v28_v5 = vld [vmem:[#allocation2] sm:$0x1]  }
   0xe   :  { %v40_v6 = vld [vmem:[#allocation2] sm:$0x1]  }
   0xf   :  { %v46_v7 = vld [vmem:[#allocation2] sm:$0x1]  }
  0x10   :  { %v7_v9 = vld [vmem:[#allocation2] sm:$0x1]  }
  0x11   :  { %9 = vst.msk [vmem:[#allocation0] sm:$0x1] %vm8_vm0, %v7_v9  }
  0x12   :  { %17 = vrot.lane.b32.xlu0 %v16_v4, %s101_s10 }
  0x13   :  { %29 = vrot.lane.b32.xlu1 %v28_v5, %s102_s11 }
  0x14   :  { %41 = vrot.lane.b32.xlu2 %v40_v6, %s103_s12 }
  0x1a   :  { %47 = vrot.lane.b32.xlu0 %v46_v7, %s104_s13 }
  0x66   :  { %v36_v8 = vpop.permute.xlu2 %35  }
  0x67   :  { %39 = vst.msk [vmem:[#allocation0 + $0x5] sm:$0x1] %vm8_vm0, %v36_v8  }
  0x6e   :  { %v42_v10 = vpop.permute.xlu2 %41  }
  0x6f   :  { %45 = vst.msk [vmem:[#allocation0 + $0x6] sm:$0x1] %vm8_vm0, %v42_v10  }
  0x7c   :  { %v12_v11 = vpop.permute.xlu0 %11  }
  0x7d   :  { %v24_v12 = vpop.permute.xlu1 %23   ;;  %15 = vst.msk [vmem:[#allocation0 + $0x1] sm:$0x1] %vm8_vm0, %v12_v11  }
  0x7e   :  { %27 = vst.msk [vmem:[#allocation0 + $0x3] sm:$0x1] %vm8_vm0, %v24_v12  }
  0x84   :  { %v18_v13 = vpop.permute.xlu0 %17  }
  0x85   :  { %v30_v14 = vpop.permute.xlu1 %29   ;;  %21 = vst.msk [vmem:[#allocation0 + $0x2] sm:$0x1] %vm8_vm0, %v18_v13  }
  0x86   :  { %33 = vst.msk [vmem:[#allocation0 + $0x4] sm:$0x1] %vm8_vm0, %v30_v14  }
  0x8c   :  { %v48_v15 = vpop.permute.xlu0 %47  }
  0x8d   :  { %51 = vst.msk [vmem:[#allocation0 + $0x7] sm:$0x1] %vm8_vm0, %v48_v15  }
  0x8e   :  { %60 = dma.vmem_to_hbm [thread:$0]  %s56_s15, 128, %s58_s1, [#allocation1]  }
  0x8f   :  { %96 = dma.done.wait [#allocation1], 128  }
  0x90   :  { %97 = vsyncadd [#allocation1], 4294967168 }
  0x91   :  { %63 = vsyncpa [#allocation1], 1 }

// kernel: seq_forward.1
= control target key start
LH: loop header
LB: loop body
LE: loop exit
PB: predicated region body
PF: predicated region fallthrough
CT: control target
= control target key end

     0   :  { %12 = vsyncpa [#allocation5], 0  ;;  %s354_s24 = smov [#allocation4]   ;;  %s355_s26 = smov 256   ;;  %s449_s0 = inlined_call_operand.vmem [shape: f32[1,1,32], index: 0, kind: input, shape index: {}]   ;;  %s450_s1 = inlined_call_operand.vmem [shape: f32[1,128], index: 1, kind: input, shape index: {}]   ;;  %s451_s2 = inlined_call_operand.vmem [shape: f32[1,64], index: 2, kind: input, shape index: {}]   ;;  %s452_s3 = inlined_call_operand.hbm [shape: f32[208,256], index: 3, kind: input, shape index: {}]   ;;  %s453_s4 = inlined_call_operand.vmem [shape: f32[1,1,128], index: 4, kind: output, shape index: {0}]   ;;  %s454_s5 = inlined_call_operand.vmem [shape: f32[1,64], index: 5, kind: output, shape index: {1}]   ;;  %s455_s6 = inlined_call_operand.vmem [shape: f32[1,64], index: 6, kind: output, shape index: {2}]  }
   0x1   :  { %s23_s23 = sshll.u32 %s452_s3, 4  ;;  %s25_s25 = sshll.u32 %s354_s24, 4  ;;  %s24_s23 = int_to_ptr.hbm [resolvable:$true] %s23_s23  ;;  %s26_s25 = int_to_ptr.vmem [resolvable:$true] %s25_s25 }
   0x2   :  { %s356_s27 = smov 16  }
   0x3   :  { %31 = dma.hbm_to_vmem [thread:$0]  %s24_s23, 6656, %s26_s25, [#allocation5], %s355_s26, %s355_s26, %s356_s27  }
   0x4   :  { %352 = dma.done.wait [#allocation5], 6656  }
   0x5   :  { %353 = vsyncadd [#allocation5], 4294960640  ;;  %v79_v0 = vld [vmem:[#allocation4 + $0xf0] sm:$0xff]  ;;  %v77_v1 = vld [vmem:[#allocation4 + $0xe0] sm:$0xff]  ;;  %vm46_vm0 = vcmask 253952   ;;  %vm43_vm1 = vcmask 516096  }
   0x6   :  { %81 = vmatpush.msra.mxu0 %v79_v0  ;;  %v75_v2 = vld [vmem:[#allocation4 + $0xd0] sm:$0xff]  ;;  %v73_v3 = vld [vmem:[#allocation4 + $0xc0] sm:$0xff]  ;;  %v40_v4 = vld [vmem:[%s450_s1] sm:$0x1]  ;;  %s358_s7 = smov 32   ;;  %s359_s8 = smov 96  }
   0x7   :  { %v45_v5 = vld [vmem:[%s449_s0] sm:$0x1]  ;;  %v71_v6 = vld [vmem:[#allocation4 + $0xb0] sm:$0xff]  ;;  %41 = vst [vmem:[#allocation2] sm:$0x1] %v40_v4  ;;  %v69_v7 = vld [vmem:[#allocation4 + $0xa0] sm:$0xff] }
   0x8   :  { %82 = vmatpush.msra.mxu0 %v77_v1  ;;  %47 = vst.msk [vmem:[#allocation2] sm:$0x1] %vm46_vm0, %v45_v5  ;;  %v67_v8 = vld [vmem:[#allocation4 + $0x90] sm:$0xff]  ;;  %v65_v9 = vld [vmem:[#allocation4 + $0x80] sm:$0xff]  ;;  %v42_v19 = vld [vmem:[%s451_s2] sm:$0x1] }
   0x9   :  { %v63_v10 = vld [vmem:[#allocation4 + $0x70] sm:$0xff]  ;;  %v61_v11 = vld [vmem:[#allocation4 + $0x60] sm:$0xff]  ;;  %44 = vst.msk [vmem:[#allocation3] sm:$0x1] %vm43_vm1, %v42_v19  ;;  %s357_s2 = smov 64   ;;  %v80_v44 = vld [vmem:[#allocation4 + $0xf8] sm:$0xff] }
   0xa   :  { %83 = vmatpush.msra.mxu0 %v75_v2  ;;  %v59_v12 = vld [vmem:[#allocation4 + $0x50] sm:$0xff]  ;;  %v57_v13 = vld [vmem:[#allocation4 + $0x40] sm:$0xff]  ;;  %v78_v45 = vld [vmem:[#allocation4 + $0xe8] sm:$0xff]  ;;  %101 = vmatpush.msra.mxu1 %v80_v44  ;;  %vm185_vm6 = vcmask 261120   ;;  %vm169_vm11 = vcmask 516352   ;;  %vm252_vm12 = vcmask 778752  }
   0xb   :  { %v55_v14 = vld [vmem:[#allocation4 + $0x30] sm:$0xff]  ;;  %v53_v15 = vld [vmem:[#allocation4 + $0x20] sm:$0xff]  ;;  %v76_v46 = vld [vmem:[#allocation4 + $0xd8] sm:$0xff] }
   0xc   :  { %84 = vmatpush.msra.mxu0 %v73_v3  ;;  %v51_v16 = vld [vmem:[#allocation4 + $0x10] sm:$0xff]  ;;  %v49_v17 = vld [vmem:[#allocation4] sm:$0xff]  ;;  %102 = vmatpush.msra.mxu1 %v78_v45  ;;  %v74_v48 = vld [vmem:[#allocation4 + $0xc8] sm:$0xff] }
   0xd   :  { %v184_v47 = vld [vmem:[#allocation4 + $0x130] sm:$0xff]  ;;  %v183_v49 = vld [vmem:[#allocation4 + $0x120] sm:$0xff]  ;;  %v72_v51 = vld [vmem:[#allocation4 + $0xb8] sm:$0xff] }
   0xe   :  { %85 = vmatpush.msra.mxu0 %v71_v6  ;;  %200 = vmatpush.msra.mxu2 %v184_v47  ;;  %v182_v50 = vld [vmem:[#allocation4 + $0x110] sm:$0xff]  ;;  %v181_v52 = vld [vmem:[#allocation4 + $0x100] sm:$0xff]  ;;  %v70_v53 = vld [vmem:[#allocation4 + $0xa8] sm:$0xff] }
   0xf   :  { %v405_v18 = vld [vmem:[#allocation2] sm:$0x1]  ;;  %103 = vmatpush.msra.mxu1 %v76_v46  ;;  %v66_v55 = vld [vmem:[#allocation4 + $0x88] sm:$0xff] }
  0x10   :  { %86 = vmatpush.msra.mxu0 %v69_v7  ;;  %v315_v36 = vld [vmem:[#allocation3] ss:$0 sm:$0xff]  ;;  %201 = vmatpush.msra.mxu2 %v183_v49  ;;  %v62_v57 = vld [vmem:[#allocation4 + $0x68] sm:$0xff] }
  0x11   :  { %104 = vmatpush.msra.mxu1 %v74_v48  ;;  %v68_v54 = vld [vmem:[#allocation4 + $0x98] sm:$0xff]  ;;  %v58_v59 = vld [vmem:[#allocation4 + $0x48] sm:$0xff] }
  0x12   :  { %87 = vmatpush.msra.mxu0 %v67_v8  ;;  %202 = vmatpush.msra.mxu2 %v182_v50  ;;  %v64_v56 = vld [vmem:[#allocation4 + $0x78] sm:$0xff]  ;;  %v54_v0 = vld [vmem:[#allocation4 + $0x28] sm:$0xff] }
  0x13   :  { %105 = vmatpush.msra.mxu1 %v72_v51  ;;  %v60_v58 = vld [vmem:[#allocation4 + $0x58] sm:$0xff]  ;;  %v50_v2 = vld [vmem:[#allocation4 + $0x8] sm:$0xff] }
  0x14   :  { %88 = vmatpush.msra.mxu0 %v65_v9  ;;  %203 = vmatpush.msra.mxu2 %v181_v52  ;;  %v56_v61 = vld [vmem:[#allocation4 + $0x38] sm:$0xff] }
  0x15   :  { %106 = vmatpush.msra.mxu1 %v70_v53  ;;  %v52_v1 = vld [vmem:[#allocation4 + $0x18] sm:$0xff] }
  0x16   :  { %89 = vmatpush.msra.mxu0 %v63_v10 }
  0x17   :  { %107 = vmatpush.msra.mxu1 %v68_v54 }
  0x18   :  { %90 = vmatpush.msra.mxu0 %v61_v11 }
  0x19   :  { %108 = vmatpush.msra.mxu1 %v66_v55 }
  0x1a   :  { %91 = vmatpush.msra.mxu0 %v59_v12 }
  0x1b   :  { %109 = vmatpush.msra.mxu1 %v64_v56 }
  0x1c   :  { %92 = vmatpush.msra.mxu0 %v57_v13 }
  0x1d   :  { %110 = vmatpush.msra.mxu1 %v62_v57 }
  0x1e   :  { %93 = vmatpush.msra.mxu0 %v55_v14 }
  0x1f   :  { %111 = vmatpush.msra.mxu1 %v60_v58 }
  0x20   :  { %94 = vmatpush.msra.mxu0 %v53_v15 }
  0x21   :  { %112 = vmatpush.msra.mxu1 %v58_v59 }
  0x22   :  { %95 = vmatpush.msra.mxu0 %v51_v16 }
  0x23   :  { %113 = vmatpush.msra.mxu1 %v56_v61 }
  0x24   :  { %96 = vmatpush.msra.mxu0 %v49_v17 }
  0x25   :  { %97 = vmatmul.f32.vlgmr.msra.gmra.mxu0 %v405_v18  ;;  %114 = vmatpush.msra.mxu1 %v54_v0 }
  0x27   :  { %115 = vmatpush.msra.mxu1 %v52_v1 }
  0x29   :  { %116 = vmatpush.msra.mxu1 %v50_v2 }
  0x2a   :  { %117 = vmatmul.f32.vlgmr.msra.gmra.mxu1 %v405_v18 }
  0xa2   :  { %v98_v20 = vpop.f32.mrf.mxu0 }
  0xa3   :  { %v303_v21 = vmul.f32 -1.442695, %v98_v20 }
  0xa5   :  { %316 = vpow2.f32 %v303_v21 }
  0xa7   :  { %v118_v4 = vpop.f32.mrf.mxu1 }
  0xab   :  { %v317_v22 = vpop.eup %316 }
  0xac   :  { %v124_v23 = vadd.f32 1.0, %v317_v22 }
  0xae   :  { %318 = vrcp.f32 %v124_v23  ;;  %v136_v27 = vand.u32 2147483648, %v124_v23  ;;  %v134_v29 = vand.u32 2147483647, %v124_v23  ;;  %vm130_vm3 = vweird.f32 %v124_v23 }
  0xb0   :  { %v137_v31 = vor.u32 1.1754944e-38, %v136_v27  ;;  %vm135_vm5 = vcmp.eq.f32.partialorder %v134_v29, 8.507059e+37 }
  0xb4   :  { %v319_v24 = vpop.eup %318 }
  0xb5   :  { %v126_v25 = vmul.f32 %v319_v24, %v124_v23  ;;  %vm131_vm2 = vweird.f32 %v319_v24 }
  0xb6   :  { %vm132_vm4 = vmor %vm130_vm3, %vm131_vm2 }
  0xb7   :  { %v127_v26 = vsub.f32 1.0, %v126_v25 }
  0xb9   :  { %v128_v28 = vmul.f32 %v319_v24, %v127_v26 }
  0xbb   :  { %v129_v30 = vadd.f32 %v319_v24, %v128_v28 }
  0xbd   :  { %v133_v32 = vsel %vm132_vm4, %v319_v24, %v129_v30 }
  0xbe   :  { %v138_v33 = vsel %vm135_vm5, %v137_v31, %v133_v32  ;;  %v263_v32 = vld [vmem:[#allocation4 + $0x170] sm:$0xff] }
  0xbf   :  { %v140_v34 = vmul.f32 2.0, %v138_v33  ;;  %281 = vmatpush.msra.mxu3 %v263_v32 }
  0xc1   :  { %v304_v35 = vadd.f32 -1.0, %v140_v34  ;;  %v261_v34 = vld [vmem:[#allocation4 + $0x150] sm:$0xff] }
  0xc3   :  { %150 = vrot.lane.b32.xlu0 %v304_v35, %s357_s2  ;;  %v260_v35 = vld [vmem:[#allocation4 + $0x140] sm:$0xff] }
  0xcb   :  { %145 = vrot.lane.b32.xlu0 %v315_v36, %s358_s7 }
 0x135   :  { %v151_v37 = vpop.permute.xlu0 %150 }
 0x136   :  { %v153_v38 = vmul.f32 %v151_v37, %v138_v33 }
 0x138   :  { %155 = vrot.lane.b32.xlu1 %v153_v38, %s358_s7 }
 0x13d   :  { %v146_v39 = vpop.permute.xlu0 %145 }
 0x13e   :  { %v148_v40 = vmul.f32 %v146_v39, %v138_v33  ;;  %v264_v39 = vld [vmem:[#allocation4 + $0x180] ss:$0 sm:$0xff] }
 0x1aa   :  { %v156_v41 = vpop.permute.xlu1 %155 }
 0x1ab   :  { %v158_v42 = vadd.f32 %v156_v41, %v148_v40 }
 0x1ad   :  { %320 = vtanh.f32 %v158_v42  ;;  %172 = vrot.lane.b32.xlu0 %v158_v42, %s359_s8 }
 0x1b3   :  { %v321_v43 = vpop.eup %320 }
 0x1b4   :  { %161 = vrot.lane.b32.xlu1 %v321_v43, %s357_s2 }
 0x21f   :  { %v173_v60 = vpop.permute.xlu0 %172 }
 0x220   :  { %175 = vst.msk [vmem:[#allocation3] sm:$0x1] %vm46_vm0, %v173_v60 }
 0x221   :  { %180 = vst.msk [vmem:[%s455_s6] sm:$0x1] %vm46_vm0, %v173_v60 }
 0x226   :  { %v162_v62 = vpop.permute.xlu1 %161 }
 0x227   :  { %v164_v63 = vmul.f32 %v162_v62, %v138_v33  ;;  %v230_v24 = vld [vmem:[#allocation3] sm:$0x1]  ;;  %v262_v33 = vld [vmem:[#allocation4 + $0x160] sm:$0xff] }
 0x228   :  { %282 = vmatpush.msra.mxu3 %v262_v33 }
 0x229   :  { %176 = vrot.lane.b32.xlu2 %v164_v63, %s358_s7 }
 0x22a   :  { %283 = vmatpush.msra.mxu3 %v261_v34 }
 0x22c   :  { %284 = vmatpush.msra.mxu3 %v260_v35 }
 0x283   :  { %v177_v3 = vpop.permute.xlu2 %176 }
 0x284   :  { %179 = vst.msk [vmem:[%s454_s5] sm:$0x1] %vm46_vm0, %v177_v3  ;;  %305 = vmatmul.msk.f32.vlgmr.msra.gmra.mxu2 %vm185_vm6, %v177_v3 }
 0x307   :  { %v205_v5 = vpop.f32.mrf.mxu2 }
 0x308   :  { %v208_v6 = vadd.f32 %v205_v5, %v118_v4 }
 0x30a   :  { %v306_v7 = vmul.f32 -1.442695, %v208_v6 }
 0x30c   :  { %322 = vpow2.f32 %v306_v7 }
 0x312   :  { %v323_v8 = vpop.eup %322 }
 0x313   :  { %v212_v9 = vadd.f32 1.0, %v323_v8 }
 0x315   :  { %324 = vrcp.f32 %v212_v9  ;;  %v224_v13 = vand.u32 2147483648, %v212_v9  ;;  %v222_v15 = vand.u32 2147483647, %v212_v9  ;;  %vm218_vm8 = vweird.f32 %v212_v9 }
 0x317   :  { %v225_v17 = vor.u32 1.1754944e-38, %v224_v13  ;;  %vm223_vm10 = vcmp.eq.f32.partialorder %v222_v15, 8.507059e+37 }
 0x31b   :  { %v325_v10 = vpop.eup %324 }
 0x31c   :  { %v214_v11 = vmul.f32 %v325_v10, %v212_v9  ;;  %vm219_vm7 = vweird.f32 %v325_v10 }
 0x31d   :  { %vm220_vm9 = vmor %vm218_vm8, %vm219_vm7 }
 0x31e   :  { %v215_v12 = vsub.f32 1.0, %v214_v11 }
 0x320   :  { %v216_v14 = vmul.f32 %v325_v10, %v215_v12 }
 0x322   :  { %v217_v16 = vadd.f32 %v325_v10, %v216_v14 }
 0x324   :  { %v221_v18 = vsel %vm220_vm9, %v325_v10, %v217_v16 }
 0x325   :  { %v226_v19 = vsel %vm223_vm10, %v225_v17, %v221_v18 }
 0x326   :  { %v228_v20 = vmul.f32 2.0, %v226_v19  ;;  %v231_v25 = vmul.f32 %v230_v24, %v226_v19 }
 0x328   :  { %v307_v21 = vadd.f32 -1.0, %v228_v20 }
 0x32a   :  { %233 = vrot.lane.b32.xlu2 %v307_v21, %s357_s2 }
 0x384   :  { %v234_v22 = vpop.permute.xlu2 %233 }
 0x385   :  { %v236_v23 = vmul.f32 %v234_v22, %v226_v19 }
 0x387   :  { %238 = vrot.lane.b32.xlu1 %v236_v23, %s358_s7 }
 0x38f   :  { %166 = vrot.lane.b32.xlu1 %v164_v63, %s357_s2 }
 0x3f9   :  { %v239_v26 = vpop.permute.xlu1 %238 }
 0x3fa   :  { %v241_v27 = vadd.f32 %v239_v26, %v231_v25 }
 0x3fc   :  { %326 = vtanh.f32 %v241_v27  ;;  %254 = vst.msk [vmem:[#allocation3] sm:$0x1] %vm169_vm11, %v241_v27 }
 0x3fd   :  { %259 = vst.msk [vmem:[%s455_s6] sm:$0x1] %vm169_vm11, %v241_v27 }
 0x401   :  { %v167_v28 = vpop.permute.xlu1 %166 }
 0x402   :  { %v327_v29 = vpop.eup %326  ;;  %170 = vst.msk [vmem:[#allocation2] sm:$0x1] %vm169_vm11, %v167_v28 }
 0x403   :  { %244 = vrot.lane.b32.xlu2 %v327_v29, %s357_s2 }
 0x45d   :  { %v245_v30 = vpop.permute.xlu2 %244 }
 0x45e   :  { %v247_v31 = vmul.f32 %v245_v30, %v226_v19 }
 0x460   :  { %249 = vrot.lane.b32.xlu2 %v247_v31, %s359_s8  ;;  %265 = vrot.lane.b32.xlu0 %v247_v31, %s358_s7 }
 0x468   :  { %255 = vrot.lane.b32.xlu0 %v247_v31, %s357_s2 }
 0x4ba   :  { %v250_v36 = vpop.permute.xlu2 %249 }
 0x4bb   :  { %253 = vst.msk [vmem:[#allocation2] sm:$0x1] %vm252_vm12, %v250_v36 }
 0x4d2   :  { %v266_v37 = vpop.permute.xlu0 %265 }
 0x4d3   :  { %308 = vmatmul.msk.f32.vlgmr.msra.gmra.mxu3 %vm185_vm6, %v266_v37 }
 0x4da   :  { %v256_v38 = vpop.permute.xlu0 %255 }
 0x4db   :  { %258 = vst.msk [vmem:[%s454_s5] sm:$0x1] %vm169_vm11, %v256_v38 }
 0x556   :  { %v286_v40 = vpop.f32.mrf.mxu3 }
 0x557   :  { %v287_v41 = vadd.f32 %v286_v40, %v264_v39 }
 0x559   :  { %289 = vst [vmem:[%s453_s4] sm:$0x1] %v287_v41 }
 0x55a   :  { %302 = vsyncpa [#allocation5], 1 }

</bundles_post_ra>
